<compile_context>
chip_gen: v5e
topology: v5e:2x2
jax: 0.10.0
libtpu: 0.0.40
codegen_flags: <defaults>
</compile_context>

<pallas_src>
import jax
import jax.numpy as jnp
import numpy as np
from jax.experimental import pallas as pl
from jax.experimental.pallas import tpu as pltpu


def _round_up(x, m):
    return (x + m - 1) // m * m


def _vmem_capacity_bytes():
    try:
        cap = int(pltpu.get_tpu_info().vmem_capacity_bytes)
        if cap > 0:
            return cap
    except Exception:
        pass
    return 64 * 1024 * 1024   # conservative (v7x) fallback


def _make_kernel(S, n_mlp, compute_dtype):
    """One (batch b, point-tile t) grid cell.

    Ref order:
      feat_ref : (1, S, TM, KC2p)  bf16, pre-reduced, center-subtracted, zero-padded
      wc_ref   : (KC2p, OCp)       shared grid-conv weight (zero-padded), bf16
      bc_ref   : (1, OCp)          conv bias, f32
      w1_ref   : (S, OCp, H1p)     first SharedMLP weight, row-split per scale, bf16
      b1_ref   : (1, H1p)          first SharedMLP bias, f32
      (n_mlp-1) x w : (Hip, Hi1p)  remaining SharedMLP weights, bf16
      (n_mlp-1) x b : (1, Hi1p)    remaining SharedMLP biases, f32
      o_ref    : (1, TM, Pp)       f32 output (lane-dense, Pp % 128 == 0)
    """
    assert n_mlp >= 1

    def kernel(*refs):
        feat_ref, wc_ref, bc_ref, w1_ref, b1_ref = refs[:5]
        w_rest = refs[5:5 + (n_mlp - 1)]
        b_rest = refs[5 + (n_mlp - 1):5 + 2 * (n_mlp - 1)]
        o_ref = refs[-1]

        tm = feat_ref.shape[2]
        kc2p = feat_ref.shape[3]
        h1p = w1_ref.shape[2]

        # Shared Conv2d((1,K)) over ALL scales as a single MXU matmul: the (S, TM)
        # leading dims collapse into the sublane axis (TM is a multiple of 16, so this
        # reshape is a no-op relayout).  Bias broadcast is applied once, hoisted.
        f = feat_ref[...].reshape(S * tm, kc2p)                               # (S*TM, KC2p)
        c = jnp.dot(f, wc_ref[...], preferred_element_type=jnp.float32)      # (S*TM, OCp)
        c = jnp.maximum(c + bc_ref[0], 0.0).astype(compute_dtype)            # Conv2d ReLU

        # Channel-concat over scales folded into the first SharedMLP layer as a
        # per-scale sum against the row-split W1 (no in-kernel concatenate).
        h = jnp.zeros((tm, h1p), jnp.float32)
        for s in range(S):
            h = h + jnp.dot(c[s * tm:(s + 1) * tm], w1_ref[s],
                            preferred_element_type=jnp.float32)
        h = jnp.maximum(h + b1_ref[0], 0.0)                                   # MLP layer 0 ReLU

        # Remaining 1x1 convs (SharedMLP).
        # TODO(synk): for very large hidden dims, process TM in 128-row sub-chunks with
        # lax.fori_loop(unroll=True) to bound the f32 live working set.
        for li in range(n_mlp - 1):
            h = jnp.dot(h.astype(compute_dtype), w_rest[li][...],
                        preferred_element_type=jnp.float32) + b_rest[li][0]
            h = jnp.maximum(h, 0.0)

        o_ref[0] = h.astype(o_ref.dtype)

    return kernel


def _interpolate_nn(xyz, new_xyz, grid_x, grid_y, lx, ly, n_nbr):
    # TODO(synk): msnet_utils.interpolate_nn / bilinear_interpolate are custom CUDA ops whose
    # exact semantics are unavailable; approximated with inverse-squared-distance NN weights.
    # TODO(synk): at production M,N this O(B*M*K*N) search should be chunked over M or moved
    # into a Pallas gather kernel with scalar-prefetched indices.
    dx = jnp.arange(-grid_x, grid_x + 1, dtype=jnp.float32) * lx
    dy = jnp.arange(-grid_y, grid_y + 1, dtype=jnp.float32) * ly
    offs = jnp.stack(jnp.meshgrid(dx, dy, indexing="ij"), axis=-1).reshape(-1, 2)   # (K, 2)
    query = new_xyz[:, :, None, :2] + offs[None, None]                  # (B, M, K, 2)
    diff = query[:, :, :, None, :] - xyz[:, None, None, :, :2]          # (B, M, K, N, 2)
    d2 = jnp.sum(diff * diff, axis=-1)                                  # (B, M, K, N)
    neg_d2, idx = jax.lax.top_k(-d2, n_nbr)                             # (B, M, K, J)
    w = 1.0 / (-neg_d2 + 1e-6)
    w = w / jnp.sum(w, axis=-1, keepdims=True)
    return idx, w.astype(jnp.float32)


class MSNetSAModuleJAX:
    def __init__(self, *, use_sample, in_channel, out_channel, mlps,
                 grid_x, grid_y, l_x, l_y, key, n_nbr=4,
                 compute_dtype=jnp.bfloat16):
        assert len(l_x) == len(l_y)
        assert mlps is not None and len(mlps) >= 2
        self.use_sample = use_sample
        self.in_channel = in_channel
        self.out_channel = out_channel
        self.grid_x = grid_x
        self.grid_y = grid_y
        self.l_x = list(l_x)
        self.l_y = list(l_y)
        self.n_nbr = n_nbr
        self.k = (2 * grid_x + 1) * (2 * grid_y + 1)
        self.mlp_dims = list(mlps)
        self.compute_dtype = compute_dtype
        S = len(self.l_x)
        assert self.mlp_dims[0] == S * out_channel, \
            "mlps[0] must equal len(l_x) * out_channel (channel concat of scales)"
        C2 = in_channel + 2
        self.c2 = C2

        # ---- lane-dense padded dims (zero padding is numerically free) ----
        self.kc2_p = _round_up(self.k * C2, 128)
        self.oc_p = _round_up(out_channel, 128)
        self.mlp_dims_p = [self.mlp_dims[0]] + [_round_up(d, 128) for d in self.mlp_dims[1:]]

        n_mlp = len(self.mlp_dims) - 1
        keys = jax.random.split(key, 2 + 2 * n_mlp)

        # Conv2d weight (shared across scales, as in the PyTorch module), torch shape
        # (out_ch, C2, 1, K); flattened m-major-compatible wc_flat[k*C2 + c, o] = W[o, c, 0, k].
        conv_w = jax.random.normal(keys[0], (out_channel, C2, self.k), jnp.float32) * 0.1
        self.wc_flat = jnp.transpose(conv_w, (2, 1, 0)).reshape(self.k * C2, out_channel) \
                          .astype(compute_dtype)
        self.bc = jax.random.normal(keys[1], (1, out_channel), jnp.float32) * 0.1

        # SharedMLP 1x1 conv weights, stored transposed (c_i, c_{i+1}) in compute dtype.
        self.mlp_ws, self.mlp_bs = [], []
        for i in range(n_mlp):
            ci, co = self.mlp_dims[i], self.mlp_dims[i + 1]
            w = jax.random.normal(keys[2 + 2 * i], (co, ci), jnp.float32) * 0.1
            b = jax.random.normal(keys[3 + 2 * i], (1, co), jnp.float32) * 0.1
            self.mlp_ws.append(jnp.transpose(w).astype(compute_dtype))
            self.mlp_bs.append(b)
        # First MLP layer split row-wise per scale (folds the channel concat into a sum).
        self.w1_parts = [self.mlp_ws[0][s * out_channel:(s + 1) * out_channel, :]
                         for s in range(S)]

        # ---- zero-padded kernel-side weights (lane-dense MXU operands) ----
        kc2 = self.k * C2
        wc_p = jnp.zeros((self.kc2_p, self.oc_p), compute_dtype)
        self.wc_p = wc_p.at[:kc2, :out_channel].set(self.wc_flat)
        bc_p = jnp.zeros((1, self.oc_p), jnp.float32)
        self.bc_p = bc_p.at[:, :out_channel].set(self.bc)

        h1p = self.mlp_dims_p[1]
        w1_p = jnp.zeros((S, self.oc_p, h1p), compute_dtype)
        for s in range(S):
            w1_p = w1_p.at[s, :out_channel, :self.mlp_dims[1]].set(self.w1_parts[s])
        self.w1_p = w1_p
        self.b1_p = jnp.zeros((1, h1p), jnp.float32).at[:, :self.mlp_dims[1]].set(self.mlp_bs[0])

        self.w_rest_p, self.b_rest_p = [], []
        for i in range(1, n_mlp):
            cip, cop = self.mlp_dims_p[i], self.mlp_dims_p[i + 1]
            wp = jnp.zeros((cip, cop), compute_dtype) \
                    .at[:self.mlp_dims[i], :self.mlp_dims[i + 1]].set(self.mlp_ws[i])
            bp = jnp.zeros((1, cop), jnp.float32) \
                    .at[:, :self.mlp_dims[i + 1]].set(self.mlp_bs[i])
            self.w_rest_p.append(wp)
            self.b_rest_p.append(bp)

    # ---------------- sampling stub ----------------
    def _resolve_new_xyz(self, xyz, new_xyz):
        if new_xyz is not None:
            return new_xyz
        # TODO(synk): use_sample / furthest_point_sample branches rely on custom CUDA ops
        # (gather_operation, furthest_point_sample); only the N<=10000 pass-through path here.
        return xyz

    # ---------------- tiling / VMEM budgeting ----------------
    def _choose_tiling(self, B, M):
        S = len(self.l_x)
        KC2p, OCp = self.kc2_p, self.oc_p
        dims_p = self.mlp_dims_p
        H1p, Pp = dims_p[1], dims_p[-1]
        itemsize = jnp.dtype(self.compute_dtype).itemsize

        cap = _vmem_capacity_bytes()
        vmem_limit = int(cap * 0.75)        # ~48 MiB scoped on v7x (64 MiB), ~96 MiB on v5e/v6e
        budget = int(cap * 0.60)            # leave headroom for Mosaic internal scratch

        # Resident (grid-invariant) weights/biases; counted double-buffered (pipeline default).
        # TODO(synk): pipeline_mode=pl.Buffered(1) on these specs would drop the 2nd buffer
        # and free VMEM for a larger TM on v7x.
        w_bytes = (KC2p * OCp * itemsize + OCp * 4
                   + S * OCp * H1p * itemsize + H1p * 4)
        for i in range(1, len(dims_p) - 1):
            w_bytes += dims_p[i] * dims_p[i + 1] * itemsize + dims_p[i + 1] * 4
        w_bytes *= 2

        # Per point-row: double-buffered feat/out tiles + f32 intermediates in the kernel.
        per_row = (2 * S * KC2p * itemsize      # stacked feat tile (x2 pipeline buffers)
                   + 2 * Pp * 4                 # f32 output tile   (x2 pipeline buffers)
                   + S * OCp * 4                # conv activation c (f32)
                   + H1p * 4                    # first-layer accumulator
                   + 2 * max(dims_p[1:]) * 4)   # widest MLP activation (+ headroom)

        tm = (budget - w_bytes) // max(per_row, 1)
        tm_cap = 1024 if cap >= 96 * 1024 * 1024 else 512   # bigger tiles on 128 MiB chips
        tm = max(16, min(int(tm), tm_cap))
        tm = (tm // 16) * 16                                 # bf16 sublane-pack friendly
        tm = min(tm, _round_up(M, 16))

        # v7x megacore: both grid axes are "parallel"; ensure >= 4 cells so neither
        # TensorCore idles (single-TC v5e/v6e unaffected).
        while B * pl.cdiv(M, tm) < 4 and tm > 16:
            tm = max(16, ((tm // 2) // 16) * 16)

        m_pad = _round_up(M, tm)
        return tm, m_pad, vmem_limit

    # ---------------- glue: build lane-dense, pre-reduced kernel input ----------------
    def _prepare_feats(self, xyz, feature, new_xyz, m_pad):
        B, N, _ = xyz.shape
        M = new_xyz.shape[1]
        xyz_feature = jnp.concatenate([xyz[:, :, :2], feature], axis=-1)        # (B, N, C2)
        C2 = xyz_feature.shape[-1]
        kc2 = self.k * C2
        center = jnp.concatenate(
            [new_xyz[:, :, :2], jnp.zeros((B, M, C2 - 2), jnp.float32)], axis=-1)  # (B, M, C2)

        per_scale = []
        for s in range(len(self.l_x)):
            idx, w = _interpolate_nn(xyz, new_xyz, self.grid_x, self.grid_y,
                                     self.l_x[s], self.l_y[s], self.n_nbr)        # (B,M,K,J)
            gathered = jax.vmap(lambda xf, ii: xf[ii])(xyz_feature, idx)           # (B,M,K,J,C2)
            # Pre-reduce the J-neighbour weighted sum + center subtraction in the wrapper.
            feat = jnp.sum(gathered * w[..., None], axis=3) - center[:, :, None, :]  # (B,M,K,C2)
            feat = feat.reshape(B, M, kc2).astype(self.compute_dtype)
            # Pad M -> m_pad and K*C2 -> KC2p at construction time (fuses with the
            # producer under jit; padded weight rows are zero so the math is unchanged).
            feat = jnp.pad(feat, ((0, 0), (0, m_pad - M), (0, self.kc2_p - kc2)))
            per_scale.append(feat)
        return jnp.stack(per_scale, axis=1)   # (B, S, M_pad, KC2p) — single stacked stream

    # ---------------- Pallas hot path ----------------
    def _run_pallas(self, feats, tm, vmem_limit):
        B, S, M_pad, KC2p = feats.shape
        Pp = self.mlp_dims_p[-1]
        n_mlp = len(self.mlp_dims) - 1

        kernel = _make_kernel(S, n_mlp, self.compute_dtype)

        inputs = [feats, self.wc_p, self.bc_p, self.w1_p, self.b1_p,
                  *self.w_rest_p, *self.b_rest_p]
        in_specs = [pl.BlockSpec((1, S, tm, KC2p), lambda b, t: (b, 0, t, 0))]
        # Small constant weights: grid-invariant index_maps keep them VMEM-resident.
        for a in inputs[1:]:
            in_specs.append(pl.BlockSpec(a.shape, lambda b, t, _nd=a.ndim: (0,) * _nd))

        out = pl.pallas_call(
            kernel,
            out_shape=jax.ShapeDtypeStruct((B, M_pad, Pp), jnp.float32),
            grid=(B, M_pad // tm),
            in_specs=in_specs,
            # Pp is a multiple of 128 -> unmasked, lane-dense vst output stores.
            # TODO(synk): emit bf16 here if the downstream consumer allows (halves writeback).
            out_specs=pl.BlockSpec((1, tm, Pp), lambda b, t: (b, t, 0)),
            compiler_params=pltpu.CompilerParams(
                dimension_semantics=("parallel", "parallel"),
                vmem_limit_bytes=vmem_limit),
        )(*inputs)
        return out

    # ---------------- plain-JAX reference for verification ----------------
    def _run_reference(self, feats, M):
        S = len(self.l_x)
        kc2 = self.k * self.c2
        h1 = None
        for s in range(S):
            f = feats[:, s, :M, :kc2]
            c = jnp.einsum("bmc,co->bmo", f, self.wc_flat,
                           preferred_element_type=jnp.float32) + self.bc[0]
            c = jnp.maximum(c, 0.0).astype(self.compute_dtype)
            t = jnp.einsum("bmo,op->bmp", c, self.w1_parts[s],
                           preferred_element_type=jnp.float32)
            h1 = t if h1 is None else h1 + t
        h = jnp.maximum(h1 + self.mlp_bs[0][0], 0.0)
        for li in range(1, len(self.mlp_dims) - 1):
            h = jnp.einsum("bmc,cd->bmd", h.astype(self.compute_dtype), self.mlp_ws[li],
                           preferred_element_type=jnp.float32) + self.mlp_bs[li][0]
            h = jnp.maximum(h, 0.0)
        return h

    def __call__(self, xyz, feature, new_xyz=None):
        new_xyz = self._resolve_new_xyz(xyz, new_xyz)
        B, M = new_xyz.shape[0], new_xyz.shape[1]
        tm, m_pad, vmem_limit = self._choose_tiling(B, M)
        feats = self._prepare_feats(xyz, feature, new_xyz, m_pad)
        out = self._run_pallas(feats, tm, vmem_limit)
        return new_xyz, out[:, :M, :self.mlp_dims[-1]]

    def reference(self, xyz, feature, new_xyz=None):
        new_xyz = self._resolve_new_xyz(xyz, new_xyz)
        M = new_xyz.shape[1]
        feats = self._prepare_feats(xyz, feature, new_xyz, M)
        return new_xyz, self._run_reference(feats, M)


if __name__ == "__main__":
    key = jax.random.PRNGKey(0)
    kp, kx, kf = jax.random.split(key, 3)

    B, N, C = 2, 16, 4                    # batch, points, feature channels (in_channel)
    out_channel = 8
    l_x, l_y = [0.5, 1.0], [0.5, 1.0]     # 2 scales -> mlps[0] = 2 * out_channel = 16
    mlps = [16, 32, 32]

    module = MSNetSAModuleJAX(use_sample=False, in_channel=C, out_channel=out_channel,
                              mlps=mlps, grid_x=1, grid_y=1, l_x=l_x, l_y=l_y, key=kp)

    xyz = jax.random.uniform(kx, (B, N, 3), jnp.float32)
    feature = jax.random.normal(kf, (B, N, C), jnp.float32)

    new_xyz, out = module(xyz, feature)
    out = jax.block_until_ready(out)

    _, ref = module.reference(xyz, feature)
    assert new_xyz.shape == (B, N, 3)
    assert out.shape == (B, N, mlps[-1])
    np.testing.assert_allclose(np.asarray(out), np.asarray(ref), rtol=1e-3, atol=1e-3)
    print("KERNEL_OK")
</pallas_src>

<mosaic_0001>
module attributes {stable_mosaic.version = 11 : i64} {
  func.func @kernel(%arg0: i32, %arg1: i32, %arg2: memref<1x2x16x128xbf16, #tpu.memory_space<vmem>>, %arg3: memref<128x128xbf16, #tpu.memory_space<vmem>>, %arg4: memref<1x128xf32, #tpu.memory_space<vmem>>, %arg5: memref<2x128x128xbf16, #tpu.memory_space<vmem>>, %arg6: memref<1x128xf32, #tpu.memory_space<vmem>>, %arg7: memref<128x128xbf16, #tpu.memory_space<vmem>>, %arg8: memref<1x128xf32, #tpu.memory_space<vmem>>, %arg9: memref<1x16x128xf32, #tpu.memory_space<vmem>>) attributes {dimension_semantics = [#tpu.dimension_semantics<parallel>, #tpu.dimension_semantics<parallel>], iteration_bounds = array<i64: 2, 1>, scalar_prefetch = 0 : i64, scratch_operands = 0 : i64, tpu.core_type = #tpu.core_type<tc>, window_params = [{transform_indices = @transform_0, window_bounds = array<i64: 1, 2, 16, 128>}, {pipeline_mode = #tpu.pipeline_mode<synchronous>, transform_indices = @transform_1, window_bounds = array<i64: 128, 128>}, {pipeline_mode = #tpu.pipeline_mode<synchronous>, transform_indices = @transform_2, window_bounds = array<i64: 1, 128>}, {pipeline_mode = #tpu.pipeline_mode<synchronous>, transform_indices = @transform_3, window_bounds = array<i64: 2, 128, 128>}, {pipeline_mode = #tpu.pipeline_mode<synchronous>, transform_indices = @transform_4, window_bounds = array<i64: 1, 128>}, {pipeline_mode = #tpu.pipeline_mode<synchronous>, transform_indices = @transform_5, window_bounds = array<i64: 128, 128>}, {pipeline_mode = #tpu.pipeline_mode<synchronous>, transform_indices = @transform_6, window_bounds = array<i64: 1, 128>}, {transform_indices = @transform_7, window_bounds = array<i64: 1, 16, 128>}]} {
    %c0 = arith.constant 0 : index
    %c0_0 = arith.constant 0 : index
    %c0_1 = arith.constant 0 : index
    %c0_2 = arith.constant 0 : index
    %0 = vector.load %arg2[%c0, %c0_0, %c0_1, %c0_2] : memref<1x2x16x128xbf16, #tpu.memory_space<vmem>>, vector<1x2x16x128xbf16>
    %1 = vector.shape_cast %0 : vector<1x2x16x128xbf16> to vector<32x128xbf16>
    %c0_3 = arith.constant 0 : index
    %c0_4 = arith.constant 0 : index
    %2 = vector.load %arg3[%c0_3, %c0_4] : memref<128x128xbf16, #tpu.memory_space<vmem>>, vector<128x128xbf16>
    %cst = arith.constant dense<0.000000e+00> : vector<32x128xf32>
    %3 = tpu.matmul %1, %2, %cst {dimension_numbers = #tpu.dot_dimension_numbers<[1], [0], [0], [1], [0, 0, 1, 1], [], []>} : vector<32x128xbf16>, vector<128x128xbf16>, vector<32x128xf32> -> vector<32x128xf32>
    %c0_5 = arith.constant 0 : index
    %c0_6 = arith.constant 0 : index
    %4 = vector.load %arg4[%c0_5, %c0_6] : memref<1x128xf32, #tpu.memory_space<vmem>>, vector<1x128xf32>
    %5 = vector.shape_cast %4 : vector<1x128xf32> to vector<128xf32>
    %6 = vector.shape_cast %5 : vector<128xf32> to vector<1x128xf32>
    %7 = vector.broadcast %6 : vector<1x128xf32> to vector<32x128xf32>
    %8 = arith.addf %3, %7 : vector<32x128xf32>
    %cst_7 = arith.constant 0.000000e+00 : f32
    %9 = vector.broadcast %cst_7 : f32 to vector<32x128xf32>
    %10 = arith.maximumf %8, %9 : vector<32x128xf32>
    %11 = arith.truncf %10 : vector<32x128xf32> to vector<32x128xbf16>
    %cst_8 = arith.constant 0.000000e+00 : f32
    %12 = vector.broadcast %cst_8 : f32 to vector<16x128xf32>
    %13 = vector.extract_strided_slice %11 {offsets = [0, 0], sizes = [16, 128], strides = [1, 1]} : vector<32x128xbf16> to vector<16x128xbf16>
    %c0_9 = arith.constant 0 : index
    %c0_10 = arith.constant 0 : index
    %c0_11 = arith.constant 0 : index
    %14 = vector.load %arg5[%c0_9, %c0_10, %c0_11] : memref<2x128x128xbf16, #tpu.memory_space<vmem>>, vector<1x128x128xbf16>
    %15 = vector.shape_cast %14 : vector<1x128x128xbf16> to vector<128x128xbf16>
    %cst_12 = arith.constant dense<0.000000e+00> : vector<16x128xf32>
    %16 = tpu.matmul %13, %15, %cst_12 {dimension_numbers = #tpu.dot_dimension_numbers<[1], [0], [0], [1], [0, 0, 1, 1], [], []>} : vector<16x128xbf16>, vector<128x128xbf16>, vector<16x128xf32> -> vector<16x128xf32>
    %17 = arith.addf %12, %16 : vector<16x128xf32>
    %18 = vector.extract_strided_slice %11 {offsets = [16, 0], sizes = [16, 128], strides = [1, 1]} : vector<32x128xbf16> to vector<16x128xbf16>
    %c1 = arith.constant 1 : index
    %c0_13 = arith.constant 0 : index
    %c0_14 = arith.constant 0 : index
    %19 = vector.load %arg5[%c1, %c0_13, %c0_14] : memref<2x128x128xbf16, #tpu.memory_space<vmem>>, vector<1x128x128xbf16>
    %20 = vector.shape_cast %19 : vector<1x128x128xbf16> to vector<128x128xbf16>
    %cst_15 = arith.constant dense<0.000000e+00> : vector<16x128xf32>
    %21 = tpu.matmul %18, %20, %cst_15 {dimension_numbers = #tpu.dot_dimension_numbers<[1], [0], [0], [1], [0, 0, 1, 1], [], []>} : vector<16x128xbf16>, vector<128x128xbf16>, vector<16x128xf32> -> vector<16x128xf32>
    %22 = arith.addf %17, %21 : vector<16x128xf32>
    %c0_16 = arith.constant 0 : index
    %c0_17 = arith.constant 0 : index
    %23 = vector.load %arg6[%c0_16, %c0_17] : memref<1x128xf32, #tpu.memory_space<vmem>>, vector<1x128xf32>
    %24 = vector.shape_cast %23 : vector<1x128xf32> to vector<128xf32>
    %25 = vector.shape_cast %24 : vector<128xf32> to vector<1x128xf32>
    %26 = vector.broadcast %25 : vector<1x128xf32> to vector<16x128xf32>
    %27 = arith.addf %22, %26 : vector<16x128xf32>
    %cst_18 = arith.constant 0.000000e+00 : f32
    %28 = vector.broadcast %cst_18 : f32 to vector<16x128xf32>
    %29 = arith.maximumf %27, %28 : vector<16x128xf32>
    %30 = arith.truncf %29 : vector<16x128xf32> to vector<16x128xbf16>
    %c0_19 = arith.constant 0 : index
    %c0_20 = arith.constant 0 : index
    %31 = vector.load %arg7[%c0_19, %c0_20] : memref<128x128xbf16, #tpu.memory_space<vmem>>, vector<128x128xbf16>
    %cst_21 = arith.constant dense<0.000000e+00> : vector<16x128xf32>
    %32 = tpu.matmul %30, %31, %cst_21 {dimension_numbers = #tpu.dot_dimension_numbers<[1], [0], [0], [1], [0, 0, 1, 1], [], []>} : vector<16x128xbf16>, vector<128x128xbf16>, vector<16x128xf32> -> vector<16x128xf32>
    %c0_22 = arith.constant 0 : index
    %c0_23 = arith.constant 0 : index
    %33 = vector.load %arg8[%c0_22, %c0_23] : memref<1x128xf32, #tpu.memory_space<vmem>>, vector<1x128xf32>
    %34 = vector.shape_cast %33 : vector<1x128xf32> to vector<128xf32>
    %35 = vector.shape_cast %34 : vector<128xf32> to vector<1x128xf32>
    %36 = vector.broadcast %35 : vector<1x128xf32> to vector<16x128xf32>
    %37 = arith.addf %32, %36 : vector<16x128xf32>
    %cst_24 = arith.constant 0.000000e+00 : f32
    %38 = vector.broadcast %cst_24 : f32 to vector<16x128xf32>
    %39 = arith.maximumf %37, %38 : vector<16x128xf32>
    %c0_25 = arith.constant 0 : index
    %c0_26 = arith.constant 0 : index
    %c0_27 = arith.constant 0 : index
    %40 = vector.load %arg9[%c0_25, %c0_26, %c0_27] : memref<1x16x128xf32, #tpu.memory_space<vmem>>, vector<1x16x128xf32>
    %41 = vector.shape_cast %40 : vector<1x16x128xf32> to vector<16x128xf32>
    %42 = vector.shape_cast %39 : vector<16x128xf32> to vector<1x16x128xf32>
    tpu.vector_store %arg9[%c0_25, %c0_26, %c0_27], %42 {strides = array<i32>} : memref<1x16x128xf32, #tpu.memory_space<vmem>>, vector<1x16x128xf32>,
    return
  }
  func.func @transform_0(%arg0: i32, %arg1: i32) -> (i32, i32, i32, i32) {
    %c0_i32 = arith.constant 0 : i32
    %c0_i32_0 = arith.constant 0 : i32
    %c0_i32_1 = arith.constant 0 : i32
    return %arg0, %c0_i32, %arg1, %c0_i32_0 : i32, i32, i32, i32
  }
  func.func @transform_1(%arg0: i32, %arg1: i32) -> (i32, i32) {
    %c0_i32 = arith.constant 0 : i32
    %c0_i32_0 = arith.constant 0 : i32
    %c0_i32_1 = arith.constant 0 : i32
    return %c0_i32, %c0_i32_0 : i32, i32
  }
  func.func @transform_2(%arg0: i32, %arg1: i32) -> (i32, i32) {
    %c0_i32 = arith.constant 0 : i32
    %c0_i32_0 = arith.constant 0 : i32
    %c0_i32_1 = arith.constant 0 : i32
    return %c0_i32, %c0_i32_0 : i32, i32
  }
  func.func @transform_3(%arg0: i32, %arg1: i32) -> (i32, i32, i32) {
    %c0_i32 = arith.constant 0 : i32
    %c0_i32_0 = arith.constant 0 : i32
    %c0_i32_1 = arith.constant 0 : i32
    %c0_i32_2 = arith.constant 0 : i32
    return %c0_i32, %c0_i32_0, %c0_i32_1 : i32, i32, i32
  }
  func.func @transform_4(%arg0: i32, %arg1: i32) -> (i32, i32) {
    %c0_i32 = arith.constant 0 : i32
    %c0_i32_0 = arith.constant 0 : i32
    %c0_i32_1 = arith.constant 0 : i32
    return %c0_i32, %c0_i32_0 : i32, i32
  }
  func.func @transform_5(%arg0: i32, %arg1: i32) -> (i32, i32) {
    %c0_i32 = arith.constant 0 : i32
    %c0_i32_0 = arith.constant 0 : i32
    %c0_i32_1 = arith.constant 0 : i32
    return %c0_i32, %c0_i32_0 : i32, i32
  }
  func.func @transform_6(%arg0: i32, %arg1: i32) -> (i32, i32) {
    %c0_i32 = arith.constant 0 : i32
    %c0_i32_0 = arith.constant 0 : i32
    %c0_i32_1 = arith.constant 0 : i32
    return %c0_i32, %c0_i32_0 : i32, i32
  }
  func.func @transform_7(%arg0: i32, %arg1: i32) -> (i32, i32, i32) {
    %c0_i32 = arith.constant 0 : i32
    %c0_i32_0 = arith.constant 0 : i32
    return %arg0, %arg1, %c0_i32 : i32, i32, i32
  }
}

</mosaic_0001>

<bundles_post_ra>
// kernel: tpu_custom_call.1
= control target key start
LH: loop header
LB: loop body
LE: loop exit
PB: predicated region body
PF: predicated region fallthrough
CT: control target
= control target key end

     0   :  { %s1628_s0 = inlined_call_operand.hbm [shape: bf16[2,2,16,128], index: 0, kind: input, shape index: {}]   ;;  %s1629_s1 = inlined_call_operand.hbm [shape: bf16[128,128], index: 1, kind: input, shape index: {}]   ;;  %s1630_s2 = inlined_call_operand.vmem [shape: f32[1,128], index: 2, kind: input, shape index: {}]   ;;  %s1631_s3 = inlined_call_operand.hbm [shape: bf16[2,128,128], index: 3, kind: input, shape index: {}]   ;;  %s1632_s4 = inlined_call_operand.vmem [shape: f32[1,128], index: 4, kind: input, shape index: {}]   ;;  %s1633_s5 = inlined_call_operand.hbm [shape: bf16[128,128], index: 5, kind: input, shape index: {}]   ;;  %s1634_s6 = inlined_call_operand.vmem [shape: f32[1,128], index: 6, kind: input, shape index: {}]   ;;  %s1635_s7 = inlined_call_operand.hbm [shape: f32[2,16,128], index: 7, kind: output, shape index: {}]  }
   0x1   :  { %1641 = sst [smem:[#allocation17_spill]] %s1629_s1 }
   0x2   :  { %1642 = sst [smem:[#allocation18_spill]] %s1631_s3 }
   0x3   :  { %1643 = sst [smem:[#allocation19_spill]] %s1633_s5 }
   0x4   :  { %12 = vsyncpa [#allocation3], 0 }
   0x5   :  { %14 = vsyncpa [#allocation3 + $0x1], 0 }
   0x6   :  { %15 = vsyncpa [#allocation6], 0 }
   0x7   :  { %16 = vsyncpa [#allocation9], 0 }
   0x8   :  { %17 = vsyncpa [#allocation4], 0 }
   0x9   :  { %19 = vsyncpa [#allocation4 + $0x1], 0  ;;  %s1430_s24 = smov 0   ;;  %s1432_s25 = smov 0  }
   0xa   :  { %s1434_s26 = smov 0   ;;  %s1436_s27 = smov 0  }
   0xb   :  { %s1438_s28 = smov 0   ;;  %s1440_s29 = smov 0  }
   0xc LB: > { %1644 = sst [smem:[#allocation15_spill]] %s1381_s29  ;;  %s878_s30 = sadd.s32 4294967295, %s1381_s29   ;;  %s1381_s29 = sphi %s1440_s29, %s25_s29   ;;  %s1377_s28 = sphi %s1438_s28, %s1665_s28   ;;  %s1373_s27 = sphi %s1436_s27, %s1664_s27   ;;  %s1369_s26 = sphi %s1434_s26, %s1663_s26   ;;  %s1365_s25 = sphi %s1432_s25, %s1662_s25   ;;  %s1361_s24 = sphi %s1430_s24, %s1661_s24  }
   0xd   : > { %s879_s8 = sadd.s32 4294967294, %s1381_s29   ;;  %p59_p0 = scmp.ne.s32.totalorder %s1365_s25, %s1361_s24 }
   0xe   : > { %p1464_p1 = scmp.eq.s32.totalorder %s878_s30, 0  ;;  %p1468_p2 = scmp.eq.s32.totalorder %s878_s30, 1 }
   0xf   : > { %p217_p3 = scmp.eq.s32.totalorder %s879_s8, 1  ;;  %p880_p5 = scmp.ge.s32.totalorder %s1381_s29, 1 }
  0x10   : > { %p1474_p4 = por %p1464_p1, %p59_p0  ;;  %p224_p7 = scmp.lt.s32.totalorder %s1381_s29, 3 }
  0x11   : > { %p1479_p6 = por %p217_p3, %p59_p0  ;;  %s1649_s1 = sld [smem:[#allocation17_spill]] }
  0x12   : > { %p1487_p8 = pnand %p880_p5, %p224_p7  ;;  %s1383_s17 = smov [#allocation5]  }
  0x13   : > { %s237_s18 = sshll.u32 %s1383_s17, 4  ;;  %p884_p11 = scmp.ge.s32.totalorder %s1381_s29, 2  ;;  %s238_s18 = int_to_ptr.vmem [resolvable:$true] %s237_s18 }
  0x14   : > { %p1087_p9 = pneg %p1487_p8  ;;  %s1652_s3 = sld [smem:[#allocation18_spill]] }
  0x15   : > { %s1636_s23 = smov 64   ;;  %s1637_s30 = smov 4  }
  0x16   : > { %p1495_p10 = pnand %p1087_p9, %p1464_p1  ;;  %s1386_s8 = smov [#allocation7]  }
  0x17   : > { %s235_s15 = sshll.u32 %s1649_s1, 4  ;;  %s254_s13 = sshll.u32 %s1386_s8, 4  ;;  %s236_s15 = int_to_ptr.hbm [resolvable:$true] %s235_s15  ;;  %s255_s13 = int_to_ptr.vmem [resolvable:$true] %s254_s13 }
  0x18   : > { %1090 = dma.hbm_to_vmem [thread:$0]  (!%p1495_p10), %s236_s15, 1024, %s238_s18, [#allocation6], %s1636_s23, %s1636_s23, %s1637_s30  }
  0x19   : > { %s1653_s5 = sld [smem:[#allocation19_spill]]  ;;  %s1387_s21 = smov [#allocation8]  }
  0x1a   : > { %s252_s22 = sshll.u32 %s1652_s3, 4  ;;  %s271_s1 = sshll.u32 %s1387_s21, 4  ;;  %s253_s22 = int_to_ptr.hbm [resolvable:$true] %s252_s22  ;;  %s272_s1 = int_to_ptr.vmem [resolvable:$true] %s271_s1 }
  0x1b   : > { %1093 = dma.hbm_to_vmem [thread:$0]  (!%p1495_p10), %s253_s22, 2048, %s255_s13, [#allocation6], %s1636_s23, %s1636_s23, %s1637_s30  }
  0x1c   : > { %s37_s15 = sadd.s32 1, %s1377_s28  ;;  %s46_s18 = sadd.s32 1, %s1369_s26 }
  0x1d   : > { %p39_p12 = scmp.ge.s32.totalorder %s37_s15, 2  ;;  %p53_p13 = scmp.ne.s32.totalorder %s1369_s26, %s1365_s25 }
  0x1e   : > { %p54_p0 = scmp.eq.s32.totalorder %s1381_s29, 0  ;;  %p1108_p7 = scmp.lt.s32.totalorder %s1381_s29, 2 }
  0x1f   : > { %s269_s20 = sshll.u32 %s1653_s5, 4  ;;  %s1667_s15 = smov (%p39_p12, %s37_s15), 0  ;;  %s270_s20 = int_to_ptr.hbm [resolvable:$true] %s269_s20 }
  0x20   : > { %1096 = dma.hbm_to_vmem [thread:$0]  (!%p1495_p10), %s270_s20, 1024, %s272_s1, [#allocation9], %s1636_s23, %s1636_s23, %s1637_s30  }
  0x21   : > { %1654 = sst [smem:[#allocation16_spill]] %s1667_s15  ;;  %p1528_p3 = por %p54_p0, %p53_p13 }
  0x22   : > { %p1534_p5 = por %p1468_p2, %p53_p13  ;;  %s41_s8 = ssub.s32 %s1377_s28, %s1667_s15 }
  0x23   : > { %p44_p9 = scmp.eq.s32.totalorder %s41_s8, 0  ;;  %s288_s1 = sand.u32 1, %s1369_s26  }
  0x24   : > { %s885_s13 = sshll.u32 %s288_s1, 4  ;;  %s1035_s17 = sshll.u32 %s1377_s28, 4 }
  0x25   : > { %s1543_s14 = scalar_select %p44_p9, %s1369_s26, %s46_s18  }
  0x26   : > { %s299_s23 = scalar_lea.hbm %s1628_s0, %s1035_s17  ;;  %s292_s30 = scalar_lea.vmem [#allocation2], %s885_s13 }
  0x27   : > { %s302_s3 = sshll.u32 %s292_s30, 4  ;;  %s300_s10 = sshll.u32 %s299_s23, 4  ;;  %s303_s3 = int_to_ptr.vmem [resolvable:$true] %s302_s3  ;;  %s301_s10 = int_to_ptr.hbm [resolvable:$true] %s300_s10 }
  0x28   : > { %p1098_p2 = pnand %p1108_p7, %p1528_p3  ;;  %s289_s5 = scalar_lea.sflag [#allocation3], %s288_s1 }
  0x29   : > { %s1657_s15 = smov 4   ;;  %s1658_s29 = smov 64  }
  0x2a   : > { %1100 = dma.hbm_to_vmem [thread:$0]  (!%p1098_p2), %s301_s10, 256, %s303_s3, %s289_s5, %s1658_s29, %s1658_s29, %s1657_s15  }
  0x2b   : > { %314 = sbr.rel (%p1487_p8) target bundleno = 535 (0x217), region = 48  ;;  %s1557_s18 = sand.u32 (!%p1487_p8), 1, %s1365_s25  }
  0x2c   : > { %s889_s23 = sshll.u32 (!%p1487_p8), %s1557_s18, 4  ;;  %s317_s30 = scalar_lea.sflag (!%p1487_p8), [#allocation3], %s1557_s18 }
  0x2d   : > { %s1563_s22 = scalar_lea.vmem (!%p1487_p8), [#allocation2], %s889_s23 }
  0x30   : > { %1344 = dma.done.wait (%p1474_p4), %s317_s30, 256  }
  0x31   : > { %1346 = vsyncadd (%p1474_p4), %s317_s30, 4294967040 }
  0x32   : > { %1348 = dma.done.wait (%p1464_p1), [#allocation6], 3072  }
  0x33   : > { %1350 = vsyncadd (%p1464_p1), [#allocation6], 4294964224 }
  0x34   : > { %1352 = dma.done.wait (%p1464_p1), [#allocation9], 1024  }
  0x35   : > { %1354 = vsyncadd (%p1464_p1), [#allocation9], 4294966272  ;;  %v1045_v0 = vld [vmem:[#allocation5 + $0x38] sm:$0xff]  ;;  %v1044_v1 = vld [vmem:[#allocation5 + $0x30] sm:$0xff]  ;;  %s1070_s15 = sshll.u32 %s1373_s27, 4  ;;  %s366_s17 = scalar_lea.vmem [#allocation10], %s889_s23 }
  0x36   : > { %453 = vmatpush.bf16.msra.mxu0 %v1045_v0  ;;  %v1043_v2 = vld [vmem:[#allocation5 + $0x28] sm:$0xff]  ;;  %v1042_v3 = vld [vmem:[#allocation5 + $0x20] sm:$0xff]  ;;  %v1041_v4 = vld [vmem:[#allocation5 + $0x18] sm:$0xff]  ;;  %s758_s13 = scalar_lea.hbm %s1635_s7, %s1070_s15  ;;  %s759_s20 = sshll.u32 %s366_s17, 4  ;;  %s760_s20 = int_to_ptr.vmem [resolvable:$true] %s759_s20 }
  0x37   : > { %v1053_v5 = vld [vmem:[#allocation7 + $0x38] sm:$0xff]  ;;  %v1040_v6 = vld [vmem:[#allocation5 + $0x10] sm:$0xff]  ;;  %v1039_v8 = vld [vmem:[#allocation5 + $0x8] sm:$0xff]  ;;  %s761_s21 = sshll.u32 %s758_s13, 4  ;;  %s745_s10 = scalar_lea.sflag [#allocation4], %s1557_s18  ;;  %s762_s21 = int_to_ptr.hbm [resolvable:$true] %s761_s21 }
  0x38   : > { %635 = vmatpush.bf16.msra.mxu2 %v1053_v5  ;;  %v1052_v7 = vld [vmem:[#allocation7 + $0x30] sm:$0xff]  ;;  %v1051_v9 = vld [vmem:[#allocation7 + $0x28] sm:$0xff]  ;;  %v1038_v10 = vld [vmem:[#allocation5] sm:$0xff]  ;;  %s1305_s30 = sshra.s32 %s762_s21, 4  ;;  %s1311_s23 = scalar_lea.hbm %s1635_s7, 32  ;;  %s1306_s30 = int_to_ptr.hbm [resolvable:$true] %s1305_s30 }
  0x39   : > { %v1036_v11 = vld [vmem:[%s1563_s22] sm:$0xff]  ;;  %v1037_v12 = vld [vmem:[%s1563_s22 + $0x8] sm:$0xff]  ;;  %s1307_s27 = scalar_lea.hbm %s1306_s30, 16  ;;  %p1312_p10 = scmp.lt.s32.totalorder %s1306_s30, %s1635_s7 }
  0x3a   : > { %454 = vmatpush.bf16.msra.mxu0 %v1044_v1  ;;  %v1050_v13 = vld [vmem:[#allocation7 + $0x20] sm:$0xff]  ;;  %v1061_v14 = vld [vmem:[#allocation7 + $0x78] sm:$0xff]  ;;  %v1060_v16 = vld [vmem:[#allocation7 + $0x70] sm:$0xff]  ;;  %p1308_p1 = scmp.ne.s32.totalorder %s1306_s30, %s1307_s27  ;;  %p1313_p12 = scmp.lt.s32.totalorder %s1311_s23, %s1307_s27 }
  0x3b   : > { %v1049_v15 = vld [vmem:[#allocation7 + $0x18] sm:$0xff]  ;;  %567 = vmatpush.bf16.msra.mxu1 %v1061_v14  ;;  %v1048_v17 = vld [vmem:[#allocation7 + $0x10] sm:$0xff]  ;;  %v1059_v18 = vld [vmem:[#allocation7 + $0x68] sm:$0xff] }
  0x3c   : > { %636 = vmatpush.bf16.msra.mxu2 %v1052_v7  ;;  %v1047_v19 = vld [vmem:[#allocation7 + $0x8] sm:$0xff]  ;;  %v1058_v20 = vld [vmem:[#allocation7 + $0x60] sm:$0xff]  ;;  %v1057_v22 = vld [vmem:[#allocation7 + $0x58] sm:$0xff]  ;;  %p1309_p4 = pnand %p1308_p1, %p1534_p5  ;;  %p1314_p13 = por %p1313_p12, %p1312_p10 }
  0x3d   : > { %v1046_v21 = vld [vmem:[#allocation7] sm:$0xff]  ;;  %v1056_v23 = vld [vmem:[#allocation7 + $0x50] sm:$0xff]  ;;  %v1055_v24 = vld [vmem:[#allocation7 + $0x48] sm:$0xff] }
  0x3e   : > { %455 = vmatpush.bf16.msra.mxu0 %v1043_v2  ;;  %v1054_v25 = vld [vmem:[#allocation7 + $0x40] sm:$0xff]  ;;  %v1069_v29 = vld [vmem:[#allocation8 + $0x38] sm:$0xff]  ;;  %v1068_v50 = vld [vmem:[#allocation8 + $0x30] sm:$0xff]  ;;  %p1310_p8 = pneg %p1309_p4 }
  0x3f   : > { %568 = vmatpush.bf16.msra.mxu1 %v1060_v16  ;;  %v1168_v26 = vld [vmem:[%s1630_s2] ss:$0 sm:$0xff]  ;;  %726 = vmatpush.bf16.msra.mxu3 %v1069_v29  ;;  %v1067_v51 = vld [vmem:[#allocation8 + $0x28] sm:$0xff]  ;;  %v1065_v53 = vld [vmem:[#allocation8 + $0x18] sm:$0xff] }
  0x40   : > { %637 = vmatpush.bf16.msra.mxu2 %v1051_v9  ;;  %v1066_v52 = vld [vmem:[#allocation8 + $0x20] sm:$0xff]  ;;  %v1064_v54 = vld [vmem:[#allocation8 + $0x10] sm:$0xff]  ;;  %v1063_v55 = vld [vmem:[#allocation8 + $0x8] sm:$0xff]  ;;  %p1315_p0 = pnand %p1314_p13, %p1310_p8 }
  0x41   : > { %v1062_v56 = vld [vmem:[#allocation8] sm:$0xff] }
  0x42   : > { %456 = vmatpush.bf16.msra.mxu0 %v1042_v3  ;;  %v1169_v60 = vld [vmem:[%s1632_s4] ss:$0 sm:$0xff] }
  0x43   : > { %569 = vmatpush.bf16.msra.mxu1 %v1059_v18  ;;  %727 = vmatpush.bf16.msra.mxu3 %v1068_v50  ;;  %v1170_v5 = vld [vmem:[%s1634_s6] ss:$0 sm:$0xff] }
  0x44   : > { %638 = vmatpush.bf16.msra.mxu2 %v1050_v13 }
  0x46   : > { %457 = vmatpush.bf16.msra.mxu0 %v1041_v4 }
  0x47   : > { %570 = vmatpush.bf16.msra.mxu1 %v1058_v20  ;;  %728 = vmatpush.bf16.msra.mxu3 %v1067_v51 }
  0x48   : > { %639 = vmatpush.bf16.msra.mxu2 %v1049_v15 }
  0x4a   : > { %458 = vmatpush.bf16.msra.mxu0 %v1040_v6 }
  0x4b   : > { %571 = vmatpush.bf16.msra.mxu1 %v1057_v22  ;;  %729 = vmatpush.bf16.msra.mxu3 %v1066_v52 }
  0x4c   : > { %640 = vmatpush.bf16.msra.mxu2 %v1048_v17 }
  0x4e   : > { %459 = vmatpush.bf16.msra.mxu0 %v1039_v8 }
  0x4f   : > { %572 = vmatpush.bf16.msra.mxu1 %v1056_v23  ;;  %730 = vmatpush.bf16.msra.mxu3 %v1065_v53 }
  0x50   : > { %641 = vmatpush.bf16.msra.mxu2 %v1047_v19 }
  0x52   : > { %460 = vmatpush.bf16.msra.mxu0 %v1038_v10 }
  0x53   : > { %573 = vmatpush.bf16.msra.mxu1 %v1055_v24  ;;  %731 = vmatpush.bf16.msra.mxu3 %v1064_v54 }
  0x54   : > { %642 = vmatpush.bf16.msra.mxu2 %v1046_v21 }
  0x55   : > { %461 = vmatmul.bf16.vlgmr.msra.gmra.mxu0 %v1036_v11 }
  0x57   : > { %574 = vmatpush.bf16.msra.mxu1 %v1054_v25  ;;  %732 = vmatpush.bf16.msra.mxu3 %v1063_v55 }
  0x5b   : > { %733 = vmatpush.bf16.msra.mxu3 %v1062_v56 }
  0x65   : > { %466 = vmatmul.bf16.gmra.mxu0 %v1037_v12 }
  0xd2   : > { %v462_v27 = vpop.f32.mrf.mxu0 }
  0xd3   : > { %v463_v28 = vadd.f32 %v1168_v26, %v462_v27 }
  0xd5   : > { %v472_v30 = vmax.f32 %v463_v28, 0.0 }
  0xd7   : > { %v476_v33 = vpack.c.bf16 %v472_v30, %v472_v30 }
  0xd9   : > { %v583_v36 = vunpack.c.l.b16 %v476_v33 }
  0xda   : > { %v464_v31 = vpop.f32.mrf.mxu0 }
  0xdb   : > { %v465_v32 = vadd.f32 %v1168_v26, %v464_v31 }
  0xdd   : > { %v473_v34 = vmax.f32 %v465_v32, 0.0 }
  0xdf   : > { %v477_v35 = vpack.c.bf16 %v473_v34, %v473_v34 }
  0xe1   : > { %v584_v37 = vunpack.c.l.b16 %v477_v35 }
  0xe2   : > { %v467_v38 = vpop.f32.mrf.mxu0 }
  0xe3   : > { %v585_v39 = vpack.c.b16 %v584_v37, %v583_v36  ;;  %v468_v40 = vadd.f32 %v1168_v26, %v467_v38 }
  0xe5   : > { %643 = vmatmul.bf16.vlgmr.msra.gmra.mxu2 %v585_v39  ;;  %v474_v41 = vmax.f32 %v468_v40, 0.0 }
  0xe7   : > { %v478_v44 = vpack.c.bf16 %v474_v41, %v474_v41 }
  0xe9   : > { %v515_v47 = vunpack.c.l.b16 %v478_v44 }
  0xea   : > { %v469_v42 = vpop.f32.mrf.mxu0 }
  0xeb   : > { %v470_v43 = vadd.f32 %v1168_v26, %v469_v42 }
  0xed   : > { %v475_v45 = vmax.f32 %v470_v43, 0.0 }
  0xef   : > { %v479_v46 = vpack.c.bf16 %v475_v45, %v475_v45 }
  0xf1   : > { %v516_v48 = vunpack.c.l.b16 %v479_v46 }
  0xf3   : > { %v517_v49 = vpack.c.b16 %v516_v48, %v515_v47 }
  0xf5   : > { %575 = vmatmul.bf16.vlgmr.msra.gmra.mxu1 %v517_v49 }
 0x168   : > { %v644_v57 = vpop.f32.mrf.mxu2 }
 0x170   : > { %v646_v61 = vpop.f32.mrf.mxu2 }
 0x172   : > { %v576_v58 = vpop.f32.mrf.mxu1 }
 0x173   : > { %v645_v59 = vadd.f32 %v644_v57, %v576_v58 }
 0x175   : > { %v653_v63 = vadd.f32 %v1169_v60, %v645_v59 }
 0x177   : > { %v655_v2 = vmax.f32 %v653_v63, 0.0 }
 0x17a   : > { %v578_v62 = vpop.f32.mrf.mxu1 }
 0x17b   : > { %v647_v0 = vadd.f32 %v646_v61, %v578_v62 }
 0x17d   : > { %v654_v1 = vadd.f32 %v1169_v60, %v647_v0 }
 0x17f   : > { %v656_v3 = vmax.f32 %v654_v1, 0.0 }
 0x181   : > { %v657_v4 = vpack.c.bf16 %v656_v3, %v655_v2 }
 0x183   : > { %734 = vmatmul.bf16.vlgmr.msra.gmra.mxu3 %v657_v4 }
 0x206   : > { %v735_v6 = vpop.f32.mrf.mxu3 }
 0x207   : > { %v736_v7 = vadd.f32 %v1170_v5, %v735_v6 }
 0x209   : > { %v740_v8 = vmax.f32 %v736_v7, 0.0 }
 0x20b   : > { %742 = vst [vmem:[%s366_s17] sm:$0xff] %v740_v8 }
 0x20e   : > { %v737_v9 = vpop.f32.mrf.mxu3 }
 0x20f   : > { %v738_v10 = vadd.f32 %v1170_v5, %v737_v9 }
 0x211   : > { %v741_v11 = vmax.f32 %v738_v10, 0.0 }
 0x213   : > { %743 = vst [vmem:[%s366_s17 + $0x8] sm:$0xff] %v741_v11 }
 0x214   : > { %1318 = shalt.err (!%p1315_p0)
}
 0x215   : > { %s1388_s18 = smov 128   ;;  %s1389_s9 = smov 8  }
 0x216   : > { %1085 = dma.vmem_to_hbm [thread:$0]  (%p1534_p5), %s760_s20, 256, %s762_s21, %s745_s10, %s1388_s18, %s1388_s18, %s1389_s9  }
 0x217 PF: > { %s1659_s11 = sld [smem:[#allocation15_spill]]  ;;  %s776_s16 = sand.u32 1, %s1361_s24  }
 0x218   : > { %p1102_p3 = pnand %p884_p11, %p1479_p6  ;;  %s777_s15 = scalar_lea.sflag [#allocation4], %s776_s16 }
 0x21a   : > { %p1103_p7 = pneg %p1102_p3 }
 0x21c   : > { %1356 = dma.done.wait (%p1103_p7), %s777_s15, 256  }
 0x21d   : > { %1358 = vsyncadd (%p1103_p7), %s777_s15, 4294967040  ;;  %s25_s29 = sadd.s32 1, %s1659_s11   ;;  %s1660_s19 = sld [smem:[#allocation16_spill]] }
 0x21e   : > { %p22_p9 = scmp.ge.s32.totalorder %s25_s29, 4   ;;  %s1661_s24 = smov %s1365_s25 }
 0x21f   : > { %s1662_s25 = smov %s1369_s26  ;;  %s1663_s26 = smov %s1543_s14 }
 0x220   : > { %s1664_s27 = smov %s1377_s28  ;;  %24 = sbr.rel (!%p22_p9) target bundleno = 12 (0xc), region = 106 }
 0x223   : > { %s1665_s28 = smov %s1660_s19 }
 0x225   :  { %783 = vsyncpa [#allocation3], 1 }
 0x226   :  { %785 = vsyncpa [#allocation3 + $0x1], 1 }
 0x227   :  { %786 = vsyncpa [#allocation6], 1 }
 0x228   :  { %787 = vsyncpa [#allocation9], 1 }
 0x229   :  { %788 = vsyncpa [#allocation4], 1 }
 0x22a   :  { %790 = vsyncpa [#allocation4 + $0x1], 1 }

</bundles_post_ra>
